<compile_context>
chip_gen: v7x
topology: tpu7x:2x2x1
jax: 0.10.0
libtpu: 0.0.40
codegen_flags: <defaults>
</compile_context>

<pallas_src>
import jax
import jax.numpy as jnp
from jax import lax
from jax.experimental import pallas as pl
from jax.experimental.pallas import tpu as pltpu


def _cdc_t_kernel(w_ref, x_ref, o_ref):
    """One batch element per grid step.

    w_ref : (C_out, KKKC)      resident weight slab (diff term folded in)
    x_ref : (1, KKKC, T*H*W)   27-tap im2col'd activations for batch n
    o_ref : (1, C_out, T*H*W)  lane-dense output tile (T*H*W in lanes)
    """
    o_ref[0] = jnp.dot(w_ref[...], x_ref[0],
                       preferred_element_type=jnp.float32).astype(o_ref.dtype)


def cdc_t_forward(x_ncthw, weight, theta=0.6, compute_dtype=jnp.bfloat16):
    """CDC_T forward.  x: (N, C_in, T, H, W), weight: (C_out, C_in, 3, 3, 3)."""
    N, C_in, T, H, W = x_ncthw.shape
    C_out, C_in_w, Kt, Kh, Kw = weight.shape
    assert C_in_w == C_in
    # TODO(synk): only the default CDC_T config (kernel=3, stride=1, padding=1,
    #             dilation=1, groups=1, bias=False) is implemented.
    assert Kt == Kh == Kw == 3, "cubic kernel=3 expected"
    K = Kt
    pad = (K - 1) // 2

    # ---- weights: fold the CDC diff term into the centre tap (in f32) -------
    w = weight.astype(jnp.float32)
    if abs(float(theta)) >= 1e-8 and K > 1:
        kernel_diff = (w[:, :, 0].sum((2, 3))
                       + w[:, :, 2].sum((2, 3)))            # (C_out, C_in)
        w = w.at[:, :, pad, pad, pad].add(-float(theta) * kernel_diff)
    KKKC = C_in * K * K * K                                  # contraction = 108
    w2d = w.reshape(C_out, KKKC)

    cd = compute_dtype if compute_dtype is not None else x_ncthw.dtype
    w2d = w2d.astype(cd)
    x = x_ncthw.astype(cd)                                   # cast before 27x inflation

    # ---- activations: full (kt, kh, kw) im2col, channels-first layout -------
    # Contraction index order must match weight.reshape(C_out, C_in*27):
    # (c_in major, then kt, kh, kw).
    xs = jnp.pad(x, ((0, 0), (0, 0), (pad, pad), (pad, pad), (pad, pad)))
    cols = [xs[:, :, kt:kt + T, kh:kh + H, kw:kw + W]        # 27 x (N,Ci,T,H,W)
            for kt in range(K) for kh in range(K) for kw in range(K)]
    THW = T * H * W
    x_col = jnp.stack(cols, axis=2).reshape(N, KKKC, THW)    # (N, 108, T*H*W)
    # TODO(synk): for large T*H*W (or C_in) split T*H*W into a second grid axis
    #             and/or build the im2col in-kernel from shifted pl.ds loads to
    #             bound per-step VMEM on v7x (64 MiB) and the 27x HBM read
    #             amplification on v5e; not needed at these shapes.

    out = pl.pallas_call(
        _cdc_t_kernel,
        out_shape=jax.ShapeDtypeStruct((N, C_out, THW), x_ncthw.dtype),
        grid=(N,),
        in_specs=[
            # full weight, constant block index -> fetched once, stays resident
            pl.BlockSpec((C_out, KKKC), lambda n: (0, 0)),
            # per-batch im2col slab
            pl.BlockSpec((1, KKKC, THW), lambda n: (n, 0, 0)),
        ],
        out_specs=pl.BlockSpec((1, C_out, THW), lambda n: (n, 0, 0)),
        compiler_params=pltpu.CompilerParams(
            dimension_semantics=("parallel",),
            vmem_limit_bytes=48 * 1024 * 1024),
    )(w2d, x_col)

    return out.reshape(N, C_out, T, H, W)                    # already NCTHW


if __name__ == "__main__":
    key = jax.random.PRNGKey(0)
    k1, k2 = jax.random.split(key)

    N, C_in, C_out, T, H, W = 2, 4, 8, 8, 16, 16
    theta = 0.6

    x = jax.random.normal(k1, (N, C_in, T, H, W), jnp.float32)
    fan_in = C_in * 3 * 3 * 3
    bound = 1.0 / (fan_in ** 0.5)
    weight = jax.random.uniform(k2, (C_out, C_in, 3, 3, 3), jnp.float32,
                                minval=-bound, maxval=bound)

    # Pure-JAX reference (semantics of the PyTorch forward).
    out_normal = lax.conv_general_dilated(
        x, weight, window_strides=(1, 1, 1),
        padding=((1, 1), (1, 1), (1, 1)),
        dimension_numbers=("NCDHW", "OIDHW", "NCDHW"))
    kernel_diff = weight[:, :, 0].sum((2, 3)) + weight[:, :, 2].sum((2, 3))
    out_diff = jnp.einsum("ncthw,oc->nothw", x, kernel_diff)
    ref = out_normal - theta * out_diff

    # f32 compute path: tight check.
    out_f32 = jax.block_until_ready(
        cdc_t_forward(x, weight, theta, compute_dtype=None))
    assert out_f32.shape == (N, C_out, T, H, W)
    if not jnp.allclose(out_f32, ref, atol=1e-4, rtol=1e-4):
        raise ValueError(
            f"f32 mismatch: max abs err = {float(jnp.max(jnp.abs(out_f32 - ref)))}")

    # bf16 default path (f32 accumulation): loose check.
    out_bf16 = jax.block_until_ready(cdc_t_forward(x, weight, theta))
    if not jnp.allclose(out_bf16, ref, atol=3e-2, rtol=3e-2):
        raise ValueError(
            f"bf16 mismatch: max abs err = {float(jnp.max(jnp.abs(out_bf16 - ref)))}")

    # theta == 0 branch must reduce to the plain conv.
    out0 = jax.block_until_ready(
        cdc_t_forward(x, weight, 0.0, compute_dtype=None))
    if not jnp.allclose(out0, out_normal, atol=1e-4, rtol=1e-4):
        raise ValueError("theta=0 branch mismatch")

    print("KERNEL_OK")
</pallas_src>

<mosaic_0001>
module attributes {stable_mosaic.version = 11 : i64} {
  func.func @_cdc_t_kernel(%arg0: i32, %arg1: memref<8x108xf32, #tpu.memory_space<vmem>>, %arg2: memref<1x108x2048xf32, #tpu.memory_space<vmem>>, %arg3: memref<1x8x2048xf32, #tpu.memory_space<vmem>>) attributes {dimension_semantics = [#tpu.dimension_semantics<parallel>], iteration_bounds = array<i64: 2>, scalar_prefetch = 0 : i64, scratch_operands = 0 : i64, tpu.core_type = #tpu.core_type<tc>, window_params = [{pipeline_mode = #tpu.pipeline_mode<synchronous>, transform_indices = @transform_0, window_bounds = array<i64: 8, 108>}, {transform_indices = @transform_1, window_bounds = array<i64: 1, 108, 2048>}, {transform_indices = @transform_2, window_bounds = array<i64: 1, 8, 2048>}]} {
    %c0 = arith.constant 0 : index
    %c0_0 = arith.constant 0 : index
    %0 = vector.load %arg1[%c0, %c0_0] : memref<8x108xf32, #tpu.memory_space<vmem>>, vector<8x108xf32>
    %c0_1 = arith.constant 0 : index
    %c0_2 = arith.constant 0 : index
    %c0_3 = arith.constant 0 : index
    %1 = vector.load %arg2[%c0_1, %c0_2, %c0_3] : memref<1x108x2048xf32, #tpu.memory_space<vmem>>, vector<1x108x2048xf32>
    %2 = vector.shape_cast %1 : vector<1x108x2048xf32> to vector<108x2048xf32>
    %cst = arith.constant dense<0.000000e+00> : vector<8x2048xf32>
    %3 = tpu.matmul %0, %2, %cst {dimension_numbers = #tpu.dot_dimension_numbers<[1], [0], [0], [1], [0, 0, 1, 1], [], []>} : vector<8x108xf32>, vector<108x2048xf32>, vector<8x2048xf32> -> vector<8x2048xf32>
    %c0_4 = arith.constant 0 : index
    %c0_5 = arith.constant 0 : index
    %c0_6 = arith.constant 0 : index
    %4 = vector.load %arg3[%c0_4, %c0_5, %c0_6] : memref<1x8x2048xf32, #tpu.memory_space<vmem>>, vector<1x8x2048xf32>
    %5 = vector.shape_cast %4 : vector<1x8x2048xf32> to vector<8x2048xf32>
    %6 = vector.shape_cast %3 : vector<8x2048xf32> to vector<1x8x2048xf32>
    tpu.vector_store %arg3[%c0_4, %c0_5, %c0_6], %6 {strides = array<i32>} : memref<1x8x2048xf32, #tpu.memory_space<vmem>>, vector<1x8x2048xf32>,
    return
  }
  func.func @transform_0(%arg0: i32) -> (i32, i32) {
    %c0_i32 = arith.constant 0 : i32
    %c0_i32_0 = arith.constant 0 : i32
    %c0_i32_1 = arith.constant 0 : i32
    return %c0_i32, %c0_i32_0 : i32, i32
  }
  func.func @transform_1(%arg0: i32) -> (i32, i32, i32) {
    %c0_i32 = arith.constant 0 : i32
    %c0_i32_0 = arith.constant 0 : i32
    %c0_i32_1 = arith.constant 0 : i32
    return %arg0, %c0_i32, %c0_i32_0 : i32, i32, i32
  }
  func.func @transform_2(%arg0: i32) -> (i32, i32, i32) {
    %c0_i32 = arith.constant 0 : i32
    %c0_i32_0 = arith.constant 0 : i32
    %c0_i32_1 = arith.constant 0 : i32
    return %arg0, %c0_i32, %c0_i32_0 : i32, i32, i32
  }
}

</mosaic_0001>

<bundles_post_ra>
// kernel: tpu_custom_call.1
= control target key start
LH: loop header
LB: loop body
LE: loop exit
PB: predicated region body
PF: predicated region fallthrough
CT: control target
= control target key end

     0   :  { %7 = vsyncpa [#allocation3], 0  ;;  %s1892_s0 = inlined_call_operand.vmem [shape: f32[8,108], index: 0, kind: input, shape index: {}]   ;;  %s1893_s1 = inlined_call_operand.vmem [shape: f32[2,108,2048], index: 1, kind: input, shape index: {}]   ;;  %s1894_s2 = inlined_call_operand.hbm [shape: f32[2,8,2048], index: 2, kind: output, shape index: {}]  }
   0x1   :  { %9 = vsyncpa [#allocation3 + $0x1], 0  ;;  %s1478_s9 = smov 0   ;;  %s1480_s10 = smov 0  }
   0x2   :  { %s1482_s11 = smov 0   ;;  %s1484_s12 = smov 0  }
   0x3 LB: > { %s1499_s13 = sadd.s32 4294967295, %s1458_s12   ;;  %s1078_s14 = sadd.s32 4294967294, %s1458_s12   ;;  %s1458_s12 = sphi %s1484_s12, %s1902_s12   ;;  %s1454_s11 = sphi %s1482_s11, %s1901_s11   ;;  %s1450_s10 = sphi %s1480_s10, %s1900_s10   ;;  %s1446_s9 = sphi %s1478_s9, %s1899_s9  }
   0x4   : > { %s1503_s15 = sadd.s32 1, %s1458_s12   ;;  %s69_s16 = sadd.s32 1, %s1454_s11 }
   0x5   : > { %s66_s17 = ssub.s32 %s1458_s12, %s1503_s15  ;;  %p79_p0 = scmp.ne.s32.totalorder %s1454_s11, %s1450_s10 }
   0x6   : > { %p67_p1 = scmp.eq.s32.totalorder %s66_s17, 0  ;;  %p80_p2 = scmp.eq.s32.totalorder %s1499_s13, 1 }
   0x7   : > { %p85_p3 = scmp.ne.s32.totalorder %s1450_s10, %s1446_s9  ;;  %p86_p4 = scmp.eq.s32.totalorder %s1078_s14, 1 }
   0x8   : > { %s1514_s18 = scalar_select %p67_p1, %s1454_s11, %s69_s16  }
   0x9   : > { %p1516_p5 = por %p80_p2, %p79_p0  ;;  %p1520_p6 = por %p86_p4, %p85_p3 }
   0xa   : > { %p1081_p7 = scmp.ge.s32.totalorder %s1458_s12, 1  ;;  %p115_p8 = scmp.lt.s32.totalorder %s1458_s12, 3 }
   0xc   : > { %p116_p9 = pnand %p1081_p7, %p115_p8 }
   0xd   : > { %p137_p10 = scmp.lt.s32.totalorder (!%p116_p9), %s1499_s13, 1  ;;  %v1460_v0 = vmov (!%p116_p9), 0.0   ;;  %vm371_vm0 = vcmask (!%p116_p9), 1043456   ;;  %vm1461_vm1 = vmmov (!%p116_p9), 1   ;;  %vm367_vm3 = vcmask (!%p116_p9), 883712   ;;  %s134_s28 = sand.u32 (!%p116_p9), 1, %s1450_s10  }
   0xe   : > { %119 = sbr.rel (%p116_p9) target bundleno = 370 (0x172), region = 28  ;;  %484 = vmatprep.mubr.f32.mxu0 (!%p116_p9), %v1460_v0  ;;  %555 = vmatprep.mubr.f32.mxu1 (!%p116_p9), %v1460_v0  ;;  %vm1587_vm2 = vmpackc.low (!%p116_p9), %vm371_vm0, %vm1461_vm1  ;;  %s1082_s29 = sshll.u32 (!%p116_p9), %s134_s28, 7 }
   0xf   : > { %s1825_s30 = scalar_lea.vmem (!%p116_p9), [#allocation2], %s1082_s29  ;;  %s1113_s3 = sshll.u32 (!%p116_p9), %s1499_s13, 11 }
  0x10   : > { %s1019_s4 = sshll.u32 (!%p116_p9), %s1825_s30, 4  ;;  %s1845_s7 = scalar_lea.hbm (!%p116_p9), %s1894_s2, %s1113_s3  ;;  %s1847_s4 = int_to_ptr.vmem [resolvable:$true] %s1019_s4 }
  0x11   : > { %s1005_s8 = scalar_lea.sflag (!%p116_p9), [#allocation3], %s134_s28  ;;  %s1462_s14 = smov (!%p116_p9), [#allocation2]  }
  0x12   : > { %s1400_s16 = sshll.u32 (!%p116_p9), %s1462_s14, 4  ;;  %s1401_s16 = int_to_ptr.vmem [resolvable:$false] %s1400_s16 }
  0x13   : > { %s1402_s17 = scalar_lea.vmem (!%p116_p9), %s1401_s16, 4096  ;;  %p1403_p0 = scmp.lt.s32.totalorder (!%p116_p9), %s1847_s4, %s1401_s16 }
  0x15   : > { %s138_s21 = scalar_select %p137_p10, %s1499_s13, 1 }
  0x16   : > { %s1396_s13 = scalar_lea.vmem %s1847_s4, 2048 }
  0x17   : > { %s1354_s22 = smul.u32 1792, %s138_s21  ;;  %p1397_p11 = scmp.ne.s32.totalorder %s1847_s4, %s1396_s13 }
  0x18   : > { %p1404_p1 = scmp.lt.s32.totalorder %s1402_s17, %s1396_s13 }
  0x19   : > { %s1533_s25 = scalar_lea.vmem %s1893_s1, %s1354_s22  ;;  %p1398_p12 = pnand %p1397_p11, %p1516_p5 }
  0x1a   : > { %v144_v1 = vld [vmem:[%s1533_s25 + $0x8] sm:$0xff]  ;;  %v146_v3 = vld [vmem:[%s1533_s25 + $0x18] sm:$0xff]  ;;  %v143_v6 = vld [vmem:[%s1533_s25] sm:$0xff]  ;;  %p1405_p2 = por %p1404_p1, %p1403_p0 }
  0x1b   : > { %v160_v2 = vld [vmem:[%s1533_s25 + $0x88] sm:$0xff]  ;;  %v162_v5 = vld [vmem:[%s1533_s25 + $0x98] sm:$0xff]  ;;  %v159_v7 = vld [vmem:[%s1533_s25 + $0x80] sm:$0xff]  ;;  %p1399_p13 = pneg %p1398_p12 }
  0x1c   : > { %v1114_v4 = vpack.c.bf16 %v160_v2, %v144_v1  ;;  %v1144_v8 = vpack.c.bf16 %v162_v5, %v146_v3  ;;  %v1116_v9 = vpack.c.bf16 %v159_v7, %v143_v6  ;;  %v145_v10 = vld [vmem:[%s1533_s25 + $0x10] sm:$0xff]  ;;  %v176_v12 = vld [vmem:[%s1533_s25 + $0x108] sm:$0xff]  ;;  %v178_v15 = vld [vmem:[%s1533_s25 + $0x118] sm:$0xff] }
  0x1d   : > { %v161_v11 = vld [vmem:[%s1533_s25 + $0x90] sm:$0xff]  ;;  %v192_v14 = vld [vmem:[%s1533_s25 + $0x188] sm:$0xff]  ;;  %v194_v16 = vld [vmem:[%s1533_s25 + $0x198] sm:$0xff]  ;;  %p1406_p3 = pnand %p1405_p2, %p1399_p13 }
  0x1e   : > { %1115 = vmatprep.subr.bf16.mxu0 %v1114_v4  ;;  %v1146_v13 = vpack.c.bf16 %v161_v11, %v145_v10  ;;  %1145 = vmatprep.subr.bf16.mxu1 %v1144_v8  ;;  %v1118_v17 = vpack.c.bf16 %v192_v14, %v176_v12  ;;  %v1148_v18 = vpack.c.bf16 %v194_v16, %v178_v15  ;;  %v175_v19 = vld [vmem:[%s1533_s25 + $0x100] sm:$0xff]  ;;  %v177_v21 = vld [vmem:[%s1533_s25 + $0x110] sm:$0xff]  ;;  %v208_v24 = vld [vmem:[%s1533_s25 + $0x208] sm:$0xff] }
  0x1f   : > { %1117 = vmatpush1.bf16.msra.mxu0 %v1116_v9  ;;  %v191_v20 = vld [vmem:[%s1533_s25 + $0x180] sm:$0xff]  ;;  %v193_v23 = vld [vmem:[%s1533_s25 + $0x190] sm:$0xff]  ;;  %v224_v25 = vld [vmem:[%s1533_s25 + $0x288] sm:$0xff] }
  0x20   : > { %1147 = vmatpush1.bf16.msra.mxu1 %v1146_v13  ;;  %v1120_v22 = vpack.c.bf16 %v191_v20, %v175_v19  ;;  %1119 = vmatprep.subr.bf16.mxu0 %v1118_v17  ;;  %v1150_v26 = vpack.c.bf16 %v193_v23, %v177_v21  ;;  %v1122_v27 = vpack.c.bf16 %v224_v25, %v208_v24  ;;  %v210_v28 = vld [vmem:[%s1533_s25 + $0x218] sm:$0xff]  ;;  %v207_v30 = vld [vmem:[%s1533_s25 + $0x200] sm:$0xff]  ;;  %v209_v33 = vld [vmem:[%s1533_s25 + $0x210] sm:$0xff] }
  0x21   : > { %1149 = vmatprep.subr.bf16.mxu1 %v1148_v18  ;;  %v226_v29 = vld [vmem:[%s1533_s25 + $0x298] sm:$0xff]  ;;  %v223_v32 = vld [vmem:[%s1533_s25 + $0x280] sm:$0xff]  ;;  %v225_v34 = vld [vmem:[%s1533_s25 + $0x290] sm:$0xff] }
  0x22   : > { %v1152_v31 = vpack.c.bf16 %v226_v29, %v210_v28  ;;  %v1124_v35 = vpack.c.bf16 %v223_v32, %v207_v30  ;;  %v240_v36 = vld [vmem:[%s1533_s25 + $0x308] sm:$0xff]  ;;  %v242_v38 = vld [vmem:[%s1533_s25 + $0x318] sm:$0xff]  ;;  %v1154_v39 = vpack.c.bf16 %v225_v34, %v209_v33  ;;  %v239_v42 = vld [vmem:[%s1533_s25 + $0x300] sm:$0xff] }
  0x23   : > { %1121 = vmatpush1.bf16.msra.mxu0 %v1120_v22  ;;  %v256_v37 = vld [vmem:[%s1533_s25 + $0x388] sm:$0xff]  ;;  %v258_v41 = vld [vmem:[%s1533_s25 + $0x398] sm:$0xff]  ;;  %v255_v43 = vld [vmem:[%s1533_s25 + $0x380] sm:$0xff] }
  0x24   : > { %1151 = vmatpush1.bf16.msra.mxu1 %v1150_v26  ;;  %1123 = vmatprep.subr.bf16.mxu0 %v1122_v27  ;;  %v1126_v40 = vpack.c.bf16 %v256_v37, %v240_v36  ;;  %v1156_v44 = vpack.c.bf16 %v258_v41, %v242_v38  ;;  %v241_v45 = vld [vmem:[%s1533_s25 + $0x310] sm:$0xff]  ;;  %v272_v47 = vld [vmem:[%s1533_s25 + $0x408] sm:$0xff]  ;;  %v274_v49 = vld [vmem:[%s1533_s25 + $0x418] sm:$0xff]  ;;  %v1128_v51 = vpack.c.bf16 %v255_v43, %v239_v42 }
  0x25   : > { %1153 = vmatprep.subr.bf16.mxu1 %v1152_v31  ;;  %v257_v46 = vld [vmem:[%s1533_s25 + $0x390] sm:$0xff]  ;;  %v288_v48 = vld [vmem:[%s1533_s25 + $0x488] sm:$0xff]  ;;  %v290_v50 = vld [vmem:[%s1533_s25 + $0x498] sm:$0xff] }
  0x26   : > { %v1158_v52 = vpack.c.bf16 %v257_v46, %v241_v45  ;;  %v1130_v53 = vpack.c.bf16 %v288_v48, %v272_v47  ;;  %v271_v54 = vld [vmem:[%s1533_s25 + $0x400] sm:$0xff]  ;;  %v273_v56 = vld [vmem:[%s1533_s25 + $0x410] sm:$0xff]  ;;  %v1160_v57 = vpack.c.bf16 %v290_v50, %v274_v49  ;;  %v304_v59 = vld [vmem:[%s1533_s25 + $0x508] sm:$0xff] }
  0x27   : > { %1125 = vmatpush1.bf16.msra.mxu0 %v1124_v35  ;;  %v287_v55 = vld [vmem:[%s1533_s25 + $0x480] sm:$0xff]  ;;  %v289_v58 = vld [vmem:[%s1533_s25 + $0x490] sm:$0xff]  ;;  %v320_v60 = vld [vmem:[%s1533_s25 + $0x588] sm:$0xff] }
  0x28   : > { %1155 = vmatpush1.bf16.msra.mxu1 %v1154_v39  ;;  %1127 = vmatprep.subr.bf16.mxu0 %v1126_v40  ;;  %v306_v61 = vld [vmem:[%s1533_s25 + $0x518] sm:$0xff]  ;;  %v1132_v63 = vpack.c.bf16 %v287_v55, %v271_v54  ;;  %v1162_v1 = vpack.c.bf16 %v289_v58, %v273_v56  ;;  %v1134_v2 = vpack.c.bf16 %v320_v60, %v304_v59  ;;  %v303_v3 = vld [vmem:[%s1533_s25 + $0x500] sm:$0xff]  ;;  %v305_v5 = vld [vmem:[%s1533_s25 + $0x510] sm:$0xff] }
  0x29   : > { %1157 = vmatprep.subr.bf16.mxu1 %v1156_v44  ;;  %v322_v62 = vld [vmem:[%s1533_s25 + $0x598] sm:$0xff]  ;;  %v319_v4 = vld [vmem:[%s1533_s25 + $0x580] sm:$0xff]  ;;  %v321_v7 = vld [vmem:[%s1533_s25 + $0x590] sm:$0xff] }
  0x2a   : > { %v1164_v6 = vpack.c.bf16 %v322_v62, %v306_v61  ;;  %v336_v8 = vld [vmem:[%s1533_s25 + $0x608] sm:$0xff]  ;;  %v338_v10 = vld [vmem:[%s1533_s25 + $0x618] sm:$0xff]  ;;  %v1136_v12 = vpack.c.bf16 %v319_v4, %v303_v3  ;;  %v1166_v14 = vpack.c.bf16 %v321_v7, %v305_v5  ;;  %v335_v16 = vld [vmem:[%s1533_s25 + $0x600] sm:$0xff] }
  0x2b   : > { %1129 = vmatpush1.bf16.msra.mxu0 %v1128_v51  ;;  %v352_v9 = vld [vmem:[%s1533_s25 + $0x688] sm:$0xf]  ;;  %v354_v11 = vld [vmem:[%s1533_s25 + $0x698] sm:$0xf]  ;;  %v351_v17 = vld [vmem:[%s1533_s25 + $0x680] sm:$0xf] }
  0x2c   : > { %1159 = vmatpush1.bf16.msra.mxu1 %v1158_v52  ;;  %1131 = vmatprep.subr.bf16.mxu0 %v1130_v53  ;;  %v1138_v15 = vpack.c.bf16 %v352_v9, %v336_v8  ;;  %v337_v18 = vld [vmem:[%s1533_s25 + $0x610] sm:$0xff]  ;;  %v1168_v19 = vpack.c.bf16 %v354_v11, %v338_v10  ;;  %v148_v21 = vld [vmem:[%s1533_s25 + $0x28] sm:$0xff]  ;;  %v150_v23 = vld [vmem:[%s1533_s25 + $0x38] sm:$0xff]  ;;  %v1141_v25 = vpack.c.bf16 %v351_v17, %v335_v16 }
  0x2d   : > { %1161 = vmatprep.subr.bf16.mxu1 %v1160_v57  ;;  %v353_v20 = vld [vmem:[%s1533_s25 + $0x690] sm:$0xf]  ;;  %v164_v22 = vld [vmem:[%s1533_s25 + $0xa8] sm:$0xff]  ;;  %v166_v24 = vld [vmem:[%s1533_s25 + $0xb8] sm:$0xff] }
  0x2e   : > { %v1171_v26 = vpack.c.bf16 %v353_v20, %v337_v18  ;;  %v1174_v27 = vpack.c.bf16 %v164_v22, %v148_v21  ;;  %v147_v28 = vld [vmem:[%s1533_s25 + $0x20] sm:$0xff]  ;;  %v149_v30 = vld [vmem:[%s1533_s25 + $0x30] sm:$0xff]  ;;  %v1204_v31 = vpack.c.bf16 %v166_v24, %v150_v23  ;;  %v180_v33 = vld [vmem:[%s1533_s25 + $0x128] sm:$0xff] }
  0x2f   : > { %1133 = vmatpush1.bf16.msra.mxu0 %v1132_v63  ;;  %v163_v29 = vld [vmem:[%s1533_s25 + $0xa0] sm:$0xff]  ;;  %v165_v32 = vld [vmem:[%s1533_s25 + $0xb0] sm:$0xff]  ;;  %v196_v34 = vld [vmem:[%s1533_s25 + $0x1a8] sm:$0xff] }
  0x30   : > { %1163 = vmatpush1.bf16.msra.mxu1 %v1162_v1  ;;  %1135 = vmatprep.subr.bf16.mxu0 %v1134_v2  ;;  %v182_v35 = vld [vmem:[%s1533_s25 + $0x138] sm:$0xff]  ;;  %v1616_v37 = vld [vmem:[%s1892_s0] sm:$0xff]  ;;  %v1176_v38 = vpack.c.bf16 %v163_v29, %v147_v28  ;;  %v1206_v39 = vpack.c.bf16 %v165_v32, %v149_v30  ;;  %v1178_v40 = vpack.c.bf16 %v196_v34, %v180_v33  ;;  %v181_v43 = vld [vmem:[%s1533_s25 + $0x130] sm:$0xff] }
  0x31   : > { %1165 = vmatprep.subr.bf16.mxu1 %v1164_v6  ;;  %v198_v36 = vld [vmem:[%s1533_s25 + $0x1b8] sm:$0xff]  ;;  %v179_v41 = vld [vmem:[%s1533_s25 + $0x120] sm:$0xff]  ;;  %v197_v45 = vld [vmem:[%s1533_s25 + $0x1b0] sm:$0xff] }
  0x32   : > { %v195_v42 = vld [vmem:[%s1533_s25 + $0x1a0] sm:$0xff]  ;;  %v1208_v44 = vpack.c.bf16 %v198_v36, %v182_v35  ;;  %v212_v46 = vld [vmem:[%s1533_s25 + $0x228] sm:$0xff]  ;;  %v214_v48 = vld [vmem:[%s1533_s25 + $0x238] sm:$0xff]  ;;  %v1210_v51 = vpack.c.bf16 %v197_v45, %v181_v43 }
  0x33   : > { %1137 = vmatpush1.bf16.msra.mxu0 %v1136_v12  ;;  %v228_v47 = vld [vmem:[%s1533_s25 + $0x2a8] sm:$0xff]  ;;  %v230_v49 = vld [vmem:[%s1533_s25 + $0x2b8] sm:$0xff]  ;;  %v1180_v50 = vpack.c.bf16 %v195_v42, %v179_v41  ;;  %v211_v53 = vld [vmem:[%s1533_s25 + $0x220] sm:$0xff] }
  0x34   : > { %1167 = vmatpush1.bf16.msra.mxu1 %v1166_v14  ;;  %1140 = vmatprep.subr.msk.bf16.mxu0 %vm1587_vm2, %v1138_v15  ;;  %v1182_v52 = vpack.c.bf16 %v228_v47, %v212_v46  ;;  %v227_v54 = vld [vmem:[%s1533_s25 + $0x2a0] sm:$0xff]  ;;  %v213_v55 = vld [vmem:[%s1533_s25 + $0x230] sm:$0xff]  ;;  %v1212_v56 = vpack.c.bf16 %v230_v49, %v214_v48  ;;  %v244_v58 = vld [vmem:[%s1533_s25 + $0x328] sm:$0xff] }
  0x35   : > { %1170 = vmatprep.subr.msk.bf16.mxu1 %vm1587_vm2, %v1168_v19  ;;  %v229_v57 = vld [vmem:[%s1533_s25 + $0x2b0] sm:$0xff]  ;;  %v260_v59 = vld [vmem:[%s1533_s25 + $0x3a8] sm:$0xff]  ;;  %v246_v60 = vld [vmem:[%s1533_s25 + $0x338] sm:$0xff]  ;;  %v1184_v62 = vpack.c.bf16 %v227_v54, %v211_v53 }
  0x36   : > { %v262_v61 = vld [vmem:[%s1533_s25 + $0x3b8] sm:$0xff]  ;;  %v1214_v63 = vpack.c.bf16 %v229_v57, %v213_v55  ;;  %v1186_v1 = vpack.c.bf16 %v260_v59, %v244_v58  ;;  %v243_v2 = vld [vmem:[%s1533_s25 + $0x320] sm:$0xff]  ;;  %v245_v4 = vld [vmem:[%s1533_s25 + $0x330] sm:$0xff] }
  0x37   : > { %1143 = vmatpush1.bf16.msk.msra.mxu0 %vm1587_vm2, %v1141_v25  ;;  %v259_v3 = vld [vmem:[%s1533_s25 + $0x3a0] sm:$0xff]  ;;  %v1216_v5 = vpack.c.bf16 %v262_v61, %v246_v60  ;;  %v261_v6 = vld [vmem:[%s1533_s25 + $0x3b0] sm:$0xff]  ;;  %v276_v7 = vld [vmem:[%s1533_s25 + $0x428] sm:$0xff] }
  0x38   : > { %1173 = vmatpush1.bf16.msk.msra.mxu1 %vm1587_vm2, %v1171_v26  ;;  %1175 = vmatprep.subr.bf16.mxu0 %v1174_v27  ;;  %v292_v8 = vld [vmem:[%s1533_s25 + $0x4a8] sm:$0xff]  ;;  %v278_v9 = vld [vmem:[%s1533_s25 + $0x438] sm:$0xff]  ;;  %v1188_v11 = vpack.c.bf16 %v259_v3, %v243_v2  ;;  %v1218_v12 = vpack.c.bf16 %v261_v6, %v245_v4  ;;  %v275_v15 = vld [vmem:[%s1533_s25 + $0x420] sm:$0xff] }
  0x39   : > { %1205 = vmatprep.subr.bf16.mxu1 %v1204_v31  ;;  %v294_v10 = vld [vmem:[%s1533_s25 + $0x4b8] sm:$0xff]  ;;  %v1190_v14 = vpack.c.bf16 %v292_v8, %v276_v7  ;;  %v291_v16 = vld [vmem:[%s1533_s25 + $0x4a0] sm:$0xff]  ;;  %v277_v17 = vld [vmem:[%s1533_s25 + $0x430] sm:$0xff] }
  0x3a   : > { %1086 = vmatmul.mubr.msk.f32.vlgmr.msra.gmra.mrb[0].mxu0 %vm367_vm3, %v1616_v37  ;;  %v1220_v18 = vpack.c.bf16 %v294_v10, %v278_v9  ;;  %v293_v19 = vld [vmem:[%s1533_s25 + $0x4b0] sm:$0xff]  ;;  %v308_v20 = vld [vmem:[%s1533_s25 + $0x528] sm:$0xff]  ;;  %v310_v22 = vld [vmem:[%s1533_s25 + $0x538] sm:$0xff]  ;;  %v1192_v24 = vpack.c.bf16 %v291_v16, %v275_v15 }
  0x3b   : > { %1089 = vmatmul.mubr.msk.f32.vlgmr.msra.gmra.mrb[0].mxu1 %vm367_vm3, %v1616_v37  ;;  %1177 = vmatpush1.bf16.msra.mxu0 %v1176_v38  ;;  %v324_v21 = vld [vmem:[%s1533_s25 + $0x5a8] sm:$0xff]  ;;  %v326_v23 = vld [vmem:[%s1533_s25 + $0x5b8] sm:$0xff]  ;;  %v1222_v25 = vpack.c.bf16 %v293_v19, %v277_v17  ;;  %v307_v27 = vld [vmem:[%s1533_s25 + $0x520] sm:$0xff] }
  0x3c   : > { %1207 = vmatpush1.bf16.msra.mxu1 %v1206_v39  ;;  %1179 = vmatprep.subr.bf16.mxu0 %v1178_v40  ;;  %v1194_v26 = vpack.c.bf16 %v324_v21, %v308_v20  ;;  %v323_v28 = vld [vmem:[%s1533_s25 + $0x5a0] sm:$0xff]  ;;  %v309_v29 = vld [vmem:[%s1533_s25 + $0x530] sm:$0xff]  ;;  %v1224_v30 = vpack.c.bf16 %v326_v23, %v310_v22  ;;  %v340_v32 = vld [vmem:[%s1533_s25 + $0x628] sm:$0xff] }
  0x3d   : > { %1209 = vmatprep.subr.bf16.mxu1 %v1208_v44  ;;  %626 = vmatprep.mubr.f32.mxu0 %v1460_v0  ;;  %v325_v31 = vld [vmem:[%s1533_s25 + $0x5b0] sm:$0xff]  ;;  %v356_v33 = vld [vmem:[%s1533_s25 + $0x6a8] sm:$0xf]  ;;  %v342_v34 = vld [vmem:[%s1533_s25 + $0x638] sm:$0xff]  ;;  %v1196_v36 = vpack.c.bf16 %v323_v28, %v307_v27 }
  0x3e   : > { %697 = vmatprep.mubr.f32.mxu1 %v1460_v0  ;;  %v358_v35 = vld [vmem:[%s1533_s25 + $0x6b8] sm:$0xf]  ;;  %v1226_v38 = vpack.c.bf16 %v325_v31, %v309_v29  ;;  %v1198_v39 = vpack.c.bf16 %v356_v33, %v340_v32  ;;  %v339_v40 = vld [vmem:[%s1533_s25 + $0x620] sm:$0xff]  ;;  %v341_v42 = vld [vmem:[%s1533_s25 + $0x630] sm:$0xff] }
  0x3f   : > { %1181 = vmatpush1.bf16.msra.mxu0 %v1180_v50  ;;  %v355_v41 = vld [vmem:[%s1533_s25 + $0x6a0] sm:$0xf]  ;;  %v1228_v43 = vpack.c.bf16 %v358_v35, %v342_v34  ;;  %v357_v44 = vld [vmem:[%s1533_s25 + $0x6b0] sm:$0xf]  ;;  %v152_v45 = vld [vmem:[%s1533_s25 + $0x48] sm:$0xff] }
  0x40   : > { %1211 = vmatpush1.bf16.msra.mxu1 %v1210_v51  ;;  %1183 = vmatprep.subr.bf16.mxu0 %v1182_v52  ;;  %v168_v46 = vld [vmem:[%s1533_s25 + $0xc8] sm:$0xff]  ;;  %v154_v47 = vld [vmem:[%s1533_s25 + $0x58] sm:$0xff]  ;;  %v1201_v49 = vpack.c.bf16 %v355_v41, %v339_v40  ;;  %v1231_v50 = vpack.c.bf16 %v357_v44, %v341_v42  ;;  %v151_v52 = vld [vmem:[%s1533_s25 + $0x40] sm:$0xff] }
  0x41   : > { %1213 = vmatprep.subr.bf16.mxu1 %v1212_v56  ;;  %v170_v48 = vld [vmem:[%s1533_s25 + $0xd8] sm:$0xff]  ;;  %v1234_v51 = vpack.c.bf16 %v168_v46, %v152_v45  ;;  %v167_v53 = vld [vmem:[%s1533_s25 + $0xc0] sm:$0xff]  ;;  %v153_v54 = vld [vmem:[%s1533_s25 + $0x50] sm:$0xff] }
  0x42   : > { %v1264_v55 = vpack.c.bf16 %v170_v48, %v154_v47  ;;  %v169_v56 = vld [vmem:[%s1533_s25 + $0xd0] sm:$0xff]  ;;  %v184_v57 = vld [vmem:[%s1533_s25 + $0x148] sm:$0xff]  ;;  %v186_v59 = vld [vmem:[%s1533_s25 + $0x158] sm:$0xff]  ;;  %v1236_v61 = vpack.c.bf16 %v167_v53, %v151_v52 }
  0x43   : > { %1185 = vmatpush1.bf16.msra.mxu0 %v1184_v62  ;;  %v200_v58 = vld [vmem:[%s1533_s25 + $0x1c8] sm:$0xff]  ;;  %v202_v60 = vld [vmem:[%s1533_s25 + $0x1d8] sm:$0xff]  ;;  %v1266_v62 = vpack.c.bf16 %v169_v56, %v153_v54  ;;  %v199_v2 = vld [vmem:[%s1533_s25 + $0x1c0] sm:$0xff] }
  0x44   : > { %1215 = vmatpush1.bf16.msra.mxu1 %v1214_v63  ;;  %1187 = vmatprep.subr.bf16.mxu0 %v1186_v1  ;;  %v1238_v63 = vpack.c.bf16 %v200_v58, %v184_v57  ;;  %v183_v1 = vld [vmem:[%s1533_s25 + $0x140] sm:$0xff]  ;;  %v185_v3 = vld [vmem:[%s1533_s25 + $0x150] sm:$0xff]  ;;  %v1268_v4 = vpack.c.bf16 %v202_v60, %v186_v59  ;;  %v216_v6 = vld [vmem:[%s1533_s25 + $0x248] sm:$0xff] }
  0x45   : > { %1217 = vmatprep.subr.bf16.mxu1 %v1216_v5  ;;  %v201_v5 = vld [vmem:[%s1533_s25 + $0x1d0] sm:$0xff]  ;;  %v232_v7 = vld [vmem:[%s1533_s25 + $0x2c8] sm:$0xff]  ;;  %v218_v8 = vld [vmem:[%s1533_s25 + $0x258] sm:$0xff]  ;;  %v1240_v10 = vpack.c.bf16 %v199_v2, %v183_v1 }
  0x46   : > { %v234_v9 = vld [vmem:[%s1533_s25 + $0x2d8] sm:$0xff]  ;;  %v231_v15 = vld [vmem:[%s1533_s25 + $0x2c0] sm:$0xff]  ;;  %v217_v16 = vld [vmem:[%s1533_s25 + $0x250] sm:$0xff] }
  0x47   : > { %1189 = vmatpush1.bf16.msra.mxu0 %v1188_v11  ;;  %v1270_v11 = vpack.c.bf16 %v201_v5, %v185_v3  ;;  %v1272_v17 = vpack.c.bf16 %v234_v9, %v218_v8  ;;  %v248_v19 = vld [vmem:[%s1533_s25 + $0x348] sm:$0xff]  ;;  %v250_v21 = vld [vmem:[%s1533_s25 + $0x358] sm:$0xff]  ;;  %v263_v27 = vld [vmem:[%s1533_s25 + $0x3c0] sm:$0xff] }
  0x48   : > { %1219 = vmatpush1.bf16.msra.mxu1 %v1218_v12  ;;  %1191 = vmatprep.subr.bf16.mxu0 %v1190_v14  ;;  %v1242_v12 = vpack.c.bf16 %v232_v7, %v216_v6  ;;  %v215_v14 = vld [vmem:[%s1533_s25 + $0x240] sm:$0xff]  ;;  %v264_v20 = vld [vmem:[%s1533_s25 + $0x3c8] sm:$0xff]  ;;  %v266_v22 = vld [vmem:[%s1533_s25 + $0x3d8] sm:$0xff] }
  0x49   : > { %1221 = vmatprep.subr.bf16.mxu1 %v1220_v18  ;;  %v233_v18 = vld [vmem:[%s1533_s25 + $0x2d0] sm:$0xff]  ;;  %v1244_v23 = vpack.c.bf16 %v231_v15, %v215_v14  ;;  %v1276_v29 = vpack.c.bf16 %v266_v22, %v250_v21  ;;  %v280_v31 = vld [vmem:[%s1533_s25 + $0x448] sm:$0xff]  ;;  %v282_v33 = vld [vmem:[%s1533_s25 + $0x458] sm:$0xff] }
  0x4a   : > { %v249_v28 = vld [vmem:[%s1533_s25 + $0x350] sm:$0xff]  ;;  %v296_v32 = vld [vmem:[%s1533_s25 + $0x4c8] sm:$0xff]  ;;  %v298_v34 = vld [vmem:[%s1533_s25 + $0x4d8] sm:$0xff] }
  0x4b   : > { %1193 = vmatpush1.bf16.msra.mxu0 %v1192_v24  ;;  %v1274_v24 = vpack.c.bf16 %v233_v18, %v217_v16  ;;  %v295_v40 = vld [vmem:[%s1533_s25 + $0x4c0] sm:$0xff]  ;;  %v281_v41 = vld [vmem:[%s1533_s25 + $0x450] sm:$0xff]  ;;  %v1280_v42 = vpack.c.bf16 %v298_v34, %v282_v33  ;;  %v312_v44 = vld [vmem:[%s1533_s25 + $0x548] sm:$0xff] }
  0x4c   : > { %1223 = vmatpush1.bf16.msra.mxu1 %v1222_v25  ;;  %1195 = vmatprep.subr.bf16.mxu0 %v1194_v26  ;;  %v1246_v25 = vpack.c.bf16 %v264_v20, %v248_v19  ;;  %v247_v26 = vld [vmem:[%s1533_s25 + $0x340] sm:$0xff]  ;;  %v328_v45 = vld [vmem:[%s1533_s25 + $0x5c8] sm:$0xff]  ;;  %v314_v46 = vld [vmem:[%s1533_s25 + $0x558] sm:$0xff] }
  0x4d   : > { %1225 = vmatprep.subr.bf16.mxu1 %v1224_v30  ;;  %v265_v30 = vld [vmem:[%s1533_s25 + $0x3d0] sm:$0xff]  ;;  %v1248_v35 = vpack.c.bf16 %v263_v27, %v247_v26  ;;  %v330_v47 = vld [vmem:[%s1533_s25 + $0x5d8] sm:$0xff]  ;;  %v327_v52 = vld [vmem:[%s1533_s25 + $0x5c0] sm:$0xff] }
  0x4e   : > { %v313_v53 = vld [vmem:[%s1533_s25 + $0x550] sm:$0xff]  ;;  %v1284_v54 = vpack.c.bf16 %v330_v47, %v314_v46  ;;  %v344_v56 = vld [vmem:[%s1533_s25 + $0x648] sm:$0xff]  ;;  %v346_v58 = vld [vmem:[%s1533_s25 + $0x658] sm:$0xff] }
  0x4f   : > { %1197 = vmatpush1.bf16.msra.mxu0 %v1196_v36  ;;  %v1278_v36 = vpack.c.bf16 %v265_v30, %v249_v28  ;;  %v360_v57 = vld [vmem:[%s1533_s25 + $0x6c8] sm:$0xf]  ;;  %v362_v59 = vld [vmem:[%s1533_s25 + $0x6d8] sm:$0xf]  ;;  %v359_v1 = vld [vmem:[%s1533_s25 + $0x6c0] sm:$0xf] }
  0x50   : > { %1227 = vmatpush1.bf16.msra.mxu1 %v1226_v38  ;;  %1200 = vmatprep.subr.msk.bf16.mxu0 %vm1587_vm2, %v1198_v39  ;;  %v1250_v38 = vpack.c.bf16 %v296_v32, %v280_v31  ;;  %v279_v39 = vld [vmem:[%s1533_s25 + $0x440] sm:$0xff]  ;;  %v345_v2 = vld [vmem:[%s1533_s25 + $0x650] sm:$0xff]  ;;  %v1288_v3 = vpack.c.bf16 %v362_v59, %v346_v58  ;;  %v156_v5 = vld [vmem:[%s1533_s25 + $0x68] sm:$0xff] }
  0x51   : > { %1230 = vmatprep.subr.msk.bf16.mxu1 %vm1587_vm2, %v1228_v43  ;;  %v297_v43 = vld [vmem:[%s1533_s25 + $0x4d0] sm:$0xff]  ;;  %v1252_v48 = vpack.c.bf16 %v295_v40, %v279_v39  ;;  %v172_v6 = vld [vmem:[%s1533_s25 + $0xe8] sm:$0xff]  ;;  %v158_v7 = vld [vmem:[%s1533_s25 + $0x78] sm:$0xff] }
  0x52   : > { %v174_v8 = vld [vmem:[%s1533_s25 + $0xf8] sm:$0xff]  ;;  %v171_v14 = vld [vmem:[%s1533_s25 + $0xe0] sm:$0xff]  ;;  %v157_v15 = vld [vmem:[%s1533_s25 + $0x70] sm:$0xff] }
  0x53   : > { %1203 = vmatpush1.bf16.msk.msra.mxu0 %vm1587_vm2, %v1201_v49  ;;  %v1282_v49 = vpack.c.bf16 %v297_v43, %v281_v41  ;;  %v1324_v16 = vpack.c.bf16 %v174_v8, %v158_v7  ;;  %v188_v18 = vld [vmem:[%s1533_s25 + $0x168] sm:$0xff]  ;;  %v190_v20 = vld [vmem:[%s1533_s25 + $0x178] sm:$0xff]  ;;  %v203_v26 = vld [vmem:[%s1533_s25 + $0x1e0] sm:$0xff] }
  0x54   : > { %1233 = vmatpush1.bf16.msk.msra.mxu1 %vm1587_vm2, %v1231_v50  ;;  %1235 = vmatprep.subr.bf16.mxu0 %v1234_v51  ;;  %v1254_v50 = vpack.c.bf16 %v328_v45, %v312_v44  ;;  %v311_v51 = vld [vmem:[%s1533_s25 + $0x540] sm:$0xff]  ;;  %v204_v19 = vld [vmem:[%s1533_s25 + $0x1e8] sm:$0xff]  ;;  %v206_v21 = vld [vmem:[%s1533_s25 + $0x1f8] sm:$0xff] }
  0x55   : > { %1265 = vmatprep.subr.bf16.mxu1 %v1264_v55  ;;  %v329_v55 = vld [vmem:[%s1533_s25 + $0x5d0] sm:$0xff]  ;;  %v1256_v60 = vpack.c.bf16 %v327_v52, %v311_v51  ;;  %v1328_v28 = vpack.c.bf16 %v206_v21, %v190_v20  ;;  %v220_v30 = vld [vmem:[%s1533_s25 + $0x268] sm:$0xff]  ;;  %v222_v32 = vld [vmem:[%s1533_s25 + $0x278] sm:$0xff] }
  0x56   : > { %1092 = vmatmul.mubr.msk.f32.vlgmr.msra.gmra.mrb[2].mxu0 %vm367_vm3, %v1616_v37  ;;  %v189_v27 = vld [vmem:[%s1533_s25 + $0x170] sm:$0xff]  ;;  %v236_v31 = vld [vmem:[%s1533_s25 + $0x2e8] sm:$0xff]  ;;  %v238_v33 = vld [vmem:[%s1533_s25 + $0x2f8] sm:$0xff] }
  0x57   : > { %1095 = vmatmul.mubr.msk.f32.vlgmr.msra.gmra.mrb[2].mxu1 %vm367_vm3, %v1616_v37  ;;  %1237 = vmatpush1.bf16.msra.mxu0 %v1236_v61  ;;  %v1286_v61 = vpack.c.bf16 %v329_v55, %v313_v53  ;;  %v235_v39 = vld [vmem:[%s1533_s25 + $0x2e0] sm:$0xff]  ;;  %v221_v40 = vld [vmem:[%s1533_s25 + $0x270] sm:$0xff]  ;;  %v1332_v41 = vpack.c.bf16 %v238_v33, %v222_v32  ;;  %v252_v43 = vld [vmem:[%s1533_s25 + $0x368] sm:$0xff] }
  0x58   : > { %1267 = vmatpush1.bf16.msra.mxu1 %v1266_v62  ;;  %1239 = vmatprep.subr.bf16.mxu0 %v1238_v63  ;;  %v1258_v62 = vpack.c.bf16 %v360_v57, %v344_v56  ;;  %v343_v63 = vld [vmem:[%s1533_s25 + $0x640] sm:$0xff]  ;;  %v268_v44 = vld [vmem:[%s1533_s25 + $0x3e8] sm:$0xff]  ;;  %v254_v45 = vld [vmem:[%s1533_s25 + $0x378] sm:$0xff] }
  0x59   : > { %1269 = vmatprep.subr.bf16.mxu1 %v1268_v4  ;;  %768 = vmatprep.mubr.f32.mxu0 %v1460_v0  ;;  %v361_v4 = vld [vmem:[%s1533_s25 + $0x6d0] sm:$0xf]  ;;  %v1261_v9 = vpack.c.bf16 %v359_v1, %v343_v63  ;;  %v270_v46 = vld [vmem:[%s1533_s25 + $0x3f8] sm:$0xff]  ;;  %v267_v51 = vld [vmem:[%s1533_s25 + $0x3e0] sm:$0xff] }
  0x5a   : > { %839 = vmatprep.mubr.f32.mxu1 %v1460_v0  ;;  %v253_v52 = vld [vmem:[%s1533_s25 + $0x370] sm:$0xff]  ;;  %v1336_v53 = vpack.c.bf16 %v270_v46, %v254_v45  ;;  %v284_v55 = vld [vmem:[%s1533_s25 + $0x468] sm:$0xff]  ;;  %v286_v56 = vld [vmem:[%s1533_s25 + $0x478] sm:$0xff] }
  0x5b   : > { %1241 = vmatpush1.bf16.msra.mxu0 %v1240_v10  ;;  %v1291_v10 = vpack.c.bf16 %v361_v4, %v345_v2  ;;  %v302_v57 = vld [vmem:[%s1533_s25 + $0x4f8] sm:$0xff]  ;;  %v285_v63 = vld [vmem:[%s1533_s25 + $0x470] sm:$0xff]  ;;  %v332_v4 = vld [vmem:[%s1533_s25 + $0x5e8] sm:$0xff] }
  0x5c   : > { %1271 = vmatpush1.bf16.msra.mxu1 %v1270_v11  ;;  %1243 = vmatprep.subr.bf16.mxu0 %v1242_v12  ;;  %v1294_v11 = vpack.c.bf16 %v172_v6, %v156_v5  ;;  %v155_v12 = vld [vmem:[%s1533_s25 + $0x60] sm:$0xff]  ;;  %v1340_v1 = vpack.c.bf16 %v302_v57, %v286_v56  ;;  %v301_v2 = vld [vmem:[%s1533_s25 + $0x4f0] sm:$0xff]  ;;  %v318_v5 = vld [vmem:[%s1533_s25 + $0x578] sm:$0xff] }
  0x5d   : > { %1273 = vmatprep.subr.bf16.mxu1 %v1272_v17  ;;  %v173_v17 = vld [vmem:[%s1533_s25 + $0xf0] sm:$0xff]  ;;  %v1296_v22 = vpack.c.bf16 %v171_v14, %v155_v12  ;;  %v334_v6 = vld [vmem:[%s1533_s25 + $0x5f8] sm:$0xff]  ;;  %v1342_v8 = vpack.c.bf16 %v301_v2, %v285_v63 }
  0x5e   : > { %v317_v12 = vld [vmem:[%s1533_s25 + $0x570] sm:$0xff]  ;;  %v1344_v14 = vpack.c.bf16 %v334_v6, %v318_v5 }
  0x5f   : > { %1245 = vmatpush1.bf16.msra.mxu0 %v1244_v23  ;;  %v1326_v23 = vpack.c.bf16 %v173_v17, %v157_v15  ;;  %v333_v15 = vld [vmem:[%s1533_s25 + $0x5f0] sm:$0xff]  ;;  %v364_v17 = vld [vmem:[%s1533_s25 + $0x6e8] sm:$0xf] }
  0x60   : > { %1275 = vmatpush1.bf16.msra.mxu1 %v1274_v24  ;;  %1247 = vmatprep.subr.bf16.mxu0 %v1246_v25  ;;  %v1298_v24 = vpack.c.bf16 %v204_v19, %v188_v18  ;;  %v187_v25 = vld [vmem:[%s1533_s25 + $0x160] sm:$0xff]  ;;  %v350_v18 = vld [vmem:[%s1533_s25 + $0x678] sm:$0xff]  ;;  %v1346_v21 = vpack.c.bf16 %v333_v15, %v317_v12 }
  0x61   : > { %1277 = vmatprep.subr.bf16.mxu1 %v1276_v29  ;;  %v205_v29 = vld [vmem:[%s1533_s25 + $0x1f0] sm:$0xff]  ;;  %v1300_v34 = vpack.c.bf16 %v203_v26, %v187_v25  ;;  %v366_v19 = vld [vmem:[%s1533_s25 + $0x6f8] sm:$0xf] }
  0x62   : > { %v1348_v25 = vpack.c.bf16 %v366_v19, %v350_v18  ;;  %v349_v26 = vld [vmem:[%s1533_s25 + $0x670] sm:$0xff] }
  0x63   : > { %1249 = vmatpush1.bf16.msra.mxu0 %v1248_v35  ;;  %v1330_v35 = vpack.c.bf16 %v205_v29, %v189_v27  ;;  %v365_v27 = vld [vmem:[%s1533_s25 + $0x6f0] sm:$0xf] }
  0x64   : > { %1279 = vmatpush1.bf16.msra.mxu1 %v1278_v36  ;;  %1251 = vmatprep.subr.bf16.mxu0 %v1250_v38  ;;  %v1302_v36 = vpack.c.bf16 %v236_v31, %v220_v30  ;;  %v219_v38 = vld [vmem:[%s1533_s25 + $0x260] sm:$0xff]  ;;  %v1351_v29 = vpack.c.bf16 %v365_v27, %v349_v26 }
  0x65   : > { %1281 = vmatprep.subr.bf16.mxu1 %v1280_v42  ;;  %v237_v42 = vld [vmem:[%s1533_s25 + $0x2f0] sm:$0xff]  ;;  %v1304_v47 = vpack.c.bf16 %v235_v39, %v219_v38 }
  0x67   : > { %1253 = vmatpush1.bf16.msra.mxu0 %v1252_v48  ;;  %v1334_v48 = vpack.c.bf16 %v237_v42, %v221_v40 }
  0x68   : > { %1283 = vmatpush1.bf16.msra.mxu1 %v1282_v49  ;;  %1255 = vmatprep.subr.bf16.mxu0 %v1254_v50  ;;  %v1306_v49 = vpack.c.bf16 %v268_v44, %v252_v43  ;;  %v251_v50 = vld [vmem:[%s1533_s25 + $0x360] sm:$0xff] }
  0x69   : > { %1285 = vmatprep.subr.bf16.mxu1 %v1284_v54  ;;  %v269_v54 = vld [vmem:[%s1533_s25 + $0x3f0] sm:$0xff]  ;;  %v1308_v58 = vpack.c.bf16 %v267_v51, %v251_v50 }
  0x6a   : > { %v1338_v59 = vpack.c.bf16 %v269_v54, %v253_v52 }
  0x6b   : > { %1257 = vmatpush1.bf16.msra.mxu0 %v1256_v60 }
  0x6c   : > { %1287 = vmatpush1.bf16.msra.mxu1 %v1286_v61  ;;  %1260 = vmatprep.subr.msk.bf16.mxu0 %vm1587_vm2, %v1258_v62  ;;  %v283_v61 = vld [vmem:[%s1533_s25 + $0x460] sm:$0xff] }
  0x6d   : > { %1290 = vmatprep.subr.msk.bf16.mxu1 %vm1587_vm2, %v1288_v3  ;;  %v299_v62 = vld [vmem:[%s1533_s25 + $0x4e0] sm:$0xff]  ;;  %v316_v3 = vld [vmem:[%s1533_s25 + $0x568] sm:$0xff] }
  0x6e   : > { %v1312_v7 = vpack.c.bf16 %v299_v62, %v283_v61 }
  0x6f   : > { %1263 = vmatpush1.bf16.msk.msra.mxu0 %vm1587_vm2, %v1261_v9  ;;  %v1314_v9 = vpack.c.bf16 %v332_v4, %v316_v3 }
  0x70   : > { %1293 = vmatpush1.bf16.msk.msra.mxu1 %vm1587_vm2, %v1291_v10  ;;  %1295 = vmatprep.subr.bf16.mxu0 %v1294_v11  ;;  %v315_v10 = vld [vmem:[%s1533_s25 + $0x560] sm:$0xff] }
  0x71   : > { %1325 = vmatprep.subr.bf16.mxu1 %v1324_v16  ;;  %v331_v11 = vld [vmem:[%s1533_s25 + $0x5e0] sm:$0xff]  ;;  %v348_v16 = vld [vmem:[%s1533_s25 + $0x668] sm:$0xff] }
  0x72   : > { %1098 = vmatmul.mubr.msk.f32.vlgmr.msra.gmra.mrb[4].mxu0 %vm367_vm3, %v1616_v37  ;;  %v1316_v20 = vpack.c.bf16 %v331_v11, %v315_v10 }
  0x73   : > { %1101 = vmatmul.mubr.msk.f32.vlgmr.msra.gmra.mrb[4].mxu1 %vm367_vm3, %v1616_v37  ;;  %1297 = vmatpush1.bf16.msra.mxu0 %v1296_v22  ;;  %v1318_v22 = vpack.c.bf16 %v364_v17, %v348_v16 }
  0x74   : > { %1327 = vmatpush1.bf16.msra.mxu1 %v1326_v23  ;;  %1299 = vmatprep.subr.bf16.mxu0 %v1298_v24  ;;  %v347_v23 = vld [vmem:[%s1533_s25 + $0x660] sm:$0xff] }
  0x75   : > { %1329 = vmatprep.subr.bf16.mxu1 %v1328_v28  ;;  %910 = vmatprep.mubr.f32.mxu0 %v1460_v0  ;;  %v363_v24 = vld [vmem:[%s1533_s25 + $0x6e0] sm:$0xf] }
  0x76   : > { %981 = vmatprep.mubr.f32.mxu1 %v1460_v0  ;;  %v300_v0 = vld [vmem:[%s1533_s25 + $0x4e8] sm:$0xff]  ;;  %v1321_v28 = vpack.c.bf16 %v363_v24, %v347_v23 }
  0x77   : > { %1301 = vmatpush1.bf16.msra.mxu0 %v1300_v34  ;;  %v1310_v60 = vpack.c.bf16 %v300_v0, %v284_v55 }
  0x78   : > { %1331 = vmatpush1.bf16.msra.mxu1 %v1330_v35  ;;  %1303 = vmatprep.subr.bf16.mxu0 %v1302_v36 }
  0x79   : > { %1333 = vmatprep.subr.bf16.mxu1 %v1332_v41 }
  0x7b   : > { %1305 = vmatpush1.bf16.msra.mxu0 %v1304_v47 }
  0x7c   : > { %1335 = vmatpush1.bf16.msra.mxu1 %v1334_v48  ;;  %1307 = vmatprep.subr.bf16.mxu0 %v1306_v49 }
  0x7d   : > { %1337 = vmatprep.subr.bf16.mxu1 %v1336_v53 }
  0x7f   : > { %1309 = vmatpush1.bf16.msra.mxu0 %v1308_v58 }
  0x80   : > { %1339 = vmatpush1.bf16.msra.mxu1 %v1338_v59  ;;  %1311 = vmatprep.subr.bf16.mxu0 %v1310_v60 }
  0x81   : > { %1341 = vmatprep.subr.bf16.mxu1 %v1340_v1 }
  0x83   : > { %1313 = vmatpush1.bf16.msra.mxu0 %v1312_v7 }
  0x84   : > { %1343 = vmatpush1.bf16.msra.mxu1 %v1342_v8  ;;  %1315 = vmatprep.subr.bf16.mxu0 %v1314_v9 }
  0x85   : > { %1345 = vmatprep.subr.bf16.mxu1 %v1344_v14 }
  0x87   : > { %1317 = vmatpush1.bf16.msra.mxu0 %v1316_v20 }
  0x88   : > { %1347 = vmatpush1.bf16.msra.mxu1 %v1346_v21  ;;  %1320 = vmatprep.subr.msk.bf16.mxu0 %vm1587_vm2, %v1318_v22 }
  0x89   : > { %1350 = vmatprep.subr.msk.bf16.mxu1 %vm1587_vm2, %v1348_v25 }
  0x8b   : > { %1323 = vmatpush1.bf16.msk.msra.mxu0 %vm1587_vm2, %v1321_v28 }
  0x8c   : > { %1353 = vmatpush1.bf16.msk.msra.mxu1 %vm1587_vm2, %v1351_v29 }
  0x8e   : > { %1104 = vmatmul.mubr.msk.f32.vlgmr.msra.gmra.mrb[6].mxu0 %vm367_vm3, %v1616_v37 }
  0x8f   : > { %1107 = vmatmul.mubr.msk.f32.vlgmr.msra.gmra.mrb[6].mxu1 %vm367_vm3, %v1616_v37 }
 0x10d   : > { %v486_v30 = vpop.f32.mrb[0].mxu0 }
 0x10e   : > { %988 = vst [vmem:[%s1825_s30] sm:$0xff] %v486_v30  ;;  %v557_v13 = vpop.f32.mrb[0].mxu1  ;;  %v488_v31 = vpop.f32.mrb[1].mxu0 }
 0x10f   : > { %990 = vst [vmem:[%s1825_s30 + $0x10] sm:$0xff] %v557_v13  ;;  %989 = vst [vmem:[%s1825_s30 + $0x8] sm:$0xff] %v488_v31  ;;  %v559_v37 = vpop.f32.mrb[1].mxu1 }
 0x110   : > { %991 = vst [vmem:[%s1825_s30 + $0x18] sm:$0xff] %v559_v37 }
 0x129   : > { %v628_v32 = vpop.f32.mrb[2].mxu0 }
 0x12a   : > { %992 = vst [vmem:[%s1825_s30 + $0x20] sm:$0xff] %v628_v32  ;;  %v699_v33 = vpop.f32.mrb[2].mxu1  ;;  %v630_v34 = vpop.f32.mrb[3].mxu0 }
 0x12b   : > { %994 = vst [vmem:[%s1825_s30 + $0x30] sm:$0xff] %v699_v33  ;;  %993 = vst [vmem:[%s1825_s30 + $0x28] sm:$0xff] %v630_v34  ;;  %v701_v35 = vpop.f32.mrb[3].mxu1 }
 0x12c   : > { %995 = vst [vmem:[%s1825_s30 + $0x38] sm:$0xff] %v701_v35 }
 0x145   : > { %v770_v36 = vpop.f32.mrb[4].mxu0 }
 0x146   : > { %996 = vst [vmem:[%s1825_s30 + $0x40] sm:$0xff] %v770_v36  ;;  %v841_v38 = vpop.f32.mrb[4].mxu1  ;;  %v772_v39 = vpop.f32.mrb[5].mxu0 }
 0x147   : > { %998 = vst [vmem:[%s1825_s30 + $0x50] sm:$0xff] %v841_v38  ;;  %997 = vst [vmem:[%s1825_s30 + $0x48] sm:$0xff] %v772_v39  ;;  %v843_v40 = vpop.f32.mrb[5].mxu1 }
 0x148   : > { %999 = vst [vmem:[%s1825_s30 + $0x58] sm:$0xff] %v843_v40 }
 0x161   : > { %v912_v41 = vpop.f32.mrb[6].mxu0 }
 0x162   : > { %1000 = vst [vmem:[%s1825_s30 + $0x60] sm:$0xff] %v912_v41  ;;  %v983_v42 = vpop.f32.mrb[6].mxu1  ;;  %v914_v43 = vpop.f32.mrb[7].mxu0 }
 0x163   : > { %1002 = vst [vmem:[%s1825_s30 + $0x70] sm:$0xff] %v983_v42  ;;  %1001 = vst [vmem:[%s1825_s30 + $0x68] sm:$0xff] %v914_v43  ;;  %v985_v44 = vpop.f32.mrb[7].mxu1 }
 0x164   : > { %1003 = vst [vmem:[%s1825_s30 + $0x78] sm:$0xff] %v985_v44 }
 0x165   : > { %1409 = shalt.err (!%p1406_p3)
}
 0x166   : > { %s1410_s21 = scalar_lea.hbm %s1845_s7, 2048  ;;  %s1414_s24 = scalar_lea.hbm %s1894_s2, 4096 }
 0x167   : > { %p1411_p4 = scmp.ne.s32.totalorder %s1845_s7, %s1410_s21  ;;  %p1415_p9 = scmp.lt.u32.totalorder %s1845_s7, %s1894_s2 }
 0x168   : > { %p1416_p10 = scmp.lt.u32.totalorder %s1414_s24, %s1410_s21  ;;  %p1418_p12 = scmp.lt.u32.totalorder %s1410_s21, %s1845_s7 }
 0x169   : > { %p1412_p7 = pnand %p1411_p4, %p1516_p5 }
 0x16a   : > { %p1417_p11 = por %p1416_p10, %p1415_p9 }
 0x16b   : > { %p1413_p8 = pneg %p1412_p7 }
 0x16c   : > { %p1419_p13 = por %p1418_p12, %p1417_p11 }
 0x16e   : > { %p1420_p0 = pnand %p1419_p13, %p1413_p8 }
 0x170   : > { %1423 = shalt.err (!%p1420_p0)
}
 0x171   : > { %1355 = dma.vmem_to_hbm [thread:$0]  (%p1516_p5), %s1847_s4, 2048, %s1845_s7, %s1005_s8  }
 0x172 PF: > { %p1361_p1 = scmp.ge.s32.totalorder %s1458_s12, 2  ;;  %s1031_s27 = sand.u32 1, %s1446_s9  }
 0x173   : > { %s1032_s28 = scalar_lea.sflag [#allocation3], %s1031_s27 }
 0x174   : > { %p1358_p2 = pnand %p1361_p1, %p1520_p6 }
 0x176   : > { %1441 = dma.done.wait (!%p1358_p2), %s1032_s28, 2048  }
 0x177   : > { %1443 = vsyncadd (!%p1358_p2), %s1032_s28, 4294965248  ;;  %p12_p3 = scmp.ge.s32.totalorder %s1503_s15, 4   ;;  %s1899_s9 = smov %s1450_s10 }
 0x178   : > { %s1900_s10 = smov %s1454_s11  ;;  %s1901_s11 = smov %s1514_s18 }
 0x179   : > { %s1902_s12 = smov %s1503_s15  ;;  %14 = sbr.rel (!%p12_p3) target bundleno = 3 (0x3), region = 63 }
 0x180   :  { %1037 = vsyncpa [#allocation3], 1 }
 0x181   :  { %1039 = vsyncpa [#allocation3 + $0x1], 1 }

</bundles_post_ra>
